<compile_context>
chip_gen: v5e
topology: v5e:2x2
jax: 0.10.0
libtpu: 0.0.40
codegen_flags: <defaults>
</compile_context>

<pallas_src>
import jax
import jax.numpy as jnp
from jax import lax
from jax.experimental import pallas as pl
from jax.experimental.pallas import tpu as pltpu


def _round_up(x, m):
    return ((x + m - 1) // m) * m


def _linear_kernel(x_ref, w_ref, b_ref, o_ref):
    # x_ref: (TM, E)   w_ref: (E, C_pad)   b_ref: (1, C)   o_ref: (TM, C)
    # MXU matmul with a lane-dense (padded) N dim, f32 accumulation.
    acc = lax.dot_general(
        x_ref[...],
        w_ref[...],
        dimension_numbers=(((1,), (0,)), ((), ())),
        preferred_element_type=jnp.float32,
    )
    c = o_ref.shape[-1]
    # Compact store: only the real C logits go back to HBM.
    o_ref[...] = (acc[:, :c] + b_ref[...]).astype(o_ref.dtype)


def _vmem_budget_bytes():
    """Generation-aware scoped-VMEM budget (v5e/v6e: 128 MiB phys, v7x: 64 MiB)."""
    try:
        cap = int(pltpu.get_tpu_info().vmem_capacity_bytes)
        return max(8 << 20, cap // 4)
    except Exception:
        return 16 << 20  # safe on every generation (v5e scoped default)


def _pick_block_m(M, E, C, C_pad, vmem_budget_bytes):
    """Row tile (multiple of 8) sized against the FULL resident VMEM footprint."""
    lane = 128
    out_lanes = _round_up(C, lane)          # (TM, C) VMEM tile pads to 128 lanes
    # TM-independent residents (BlockSpec double-buffers them):
    fixed = 2 * E * C_pad * 4               # weight (E, C_pad), f32
    fixed += 2 * 8 * lane * 4               # bias (1, C) -> (8, 128) tile
    headroom = 2 << 20                      # Mosaic internal scratch / regalloc
    budget = max(1 << 20, vmem_budget_bytes - fixed - headroom)
    # Per-row bytes: 2x streamed x tile + 2x output tile + f32 dot-result temp.
    per_row = (2 * E + 2 * out_lanes + C_pad) * 4
    tm = max(8, budget // per_row)
    # Keep >= ~8 grid steps when M is large (pipelining + megacore split),
    # but never shrink below 512 rows (already ~85% of HBM roofline).
    min_steps_tile = _round_up(-(-M // 8), 8)
    tm = min(tm, max(512, min_steps_tile))
    tm = max(8, (tm // 8) * 8)
    tm = min(tm, _round_up(M, 8))
    return int(tm)


def classification_head(hidden_state, weight, bias):
    """hidden_state: (..., E); weight: (C, E); bias: (C,)  ->  (..., C)."""
    *lead, E = hidden_state.shape
    C = weight.shape[0]

    x = hidden_state.reshape(-1, E)  # (M, E) -- no padding copy of x
    M = x.shape[0]

    # Lane-dense MXU N-dim: pad the tiny weight once (and pre-transpose to the
    # MXU's native (K, N) RHS layout).  Bias stays compact at (1, C).
    C_pad = _round_up(max(C, 1), 128)
    w_t = jnp.zeros((E, C_pad), dtype=weight.dtype).at[:, :C].set(weight.T)
    b2 = bias.reshape(1, C)

    vmem_budget = _vmem_budget_bytes()
    TM = _pick_block_m(M, E, C, C_pad, vmem_budget)
    grid = (pl.cdiv(M, TM),)  # ragged last block handled by Pallas boundary masking

    cost = pl.CostEstimate(
        flops=2 * M * E * C_pad,
        transcendentals=0,
        bytes_accessed=(M * E + E * C_pad + C + M * C) * 4,
    )

    out = pl.pallas_call(
        _linear_kernel,
        out_shape=jax.ShapeDtypeStruct((M, C), hidden_state.dtype),
        grid_spec=pltpu.PrefetchScalarGridSpec(
            num_scalar_prefetch=0,
            grid=grid,
            in_specs=[
                pl.BlockSpec((TM, E), lambda i: (i, 0)),      # streamed x tiles
                pl.BlockSpec((E, C_pad), lambda i: (0, 0)),   # resident weight (K, N)
                pl.BlockSpec((1, C), lambda i: (0, 0)),       # resident bias
            ],
            out_specs=pl.BlockSpec((TM, C), lambda i: (i, 0)),  # compact logits
        ),
        compiler_params=pltpu.CompilerParams(
            dimension_semantics=("parallel",),   # shard M grid across TCs (v7x)
            vmem_limit_bytes=int(vmem_budget),
        ),
        cost_estimate=cost,
    )(x, w_t, b2)

    return out.reshape(*lead, C)


if __name__ == "__main__":
    # Small shapes consistent with the module's forward.
    batch, seq = 2, 8
    embed_size = 256
    class_size = 5

    key = jax.random.PRNGKey(0)
    k_x, k_w, k_b = jax.random.split(key, 3)

    hidden_state = jax.random.normal(k_x, (batch, seq, embed_size), dtype=jnp.float32)

    # Deterministic init mimicking torch.nn.Linear: U(-1/sqrt(E), 1/sqrt(E)).
    bound = 1.0 / (embed_size ** 0.5)
    weight = jax.random.uniform(
        k_w, (class_size, embed_size), minval=-bound, maxval=bound, dtype=jnp.float32
    )
    bias = jax.random.uniform(
        k_b, (class_size,), minval=-bound, maxval=bound, dtype=jnp.float32
    )

    logits = classification_head(hidden_state, weight, bias)
    jax.block_until_ready(logits)

    # Reference check in plain JAX (same semantics as torch.nn.Linear).
    ref = hidden_state @ weight.T + bias
    assert logits.shape == (batch, seq, class_size)
    assert jnp.allclose(logits, ref, atol=1e-5, rtol=1e-5)

    print("KERNEL_OK")
</pallas_src>

<mosaic_0001>
module attributes {stable_mosaic.version = 11 : i64} {
  func.func @_linear_kernel(%arg0: i32, %arg1: memref<16x256xf32, #tpu.memory_space<vmem>>, %arg2: memref<256x128xf32, #tpu.memory_space<vmem>>, %arg3: memref<1x5xf32, #tpu.memory_space<vmem>>, %arg4: memref<16x5xf32, #tpu.memory_space<vmem>>) attributes {dimension_semantics = [#tpu.dimension_semantics<parallel>], iteration_bounds = array<i64: 1>, scalar_prefetch = 0 : i64, scratch_operands = 0 : i64, tpu.core_type = #tpu.core_type<tc>, window_params = [{transform_indices = @transform_0, window_bounds = array<i64: 16, 256>}, {pipeline_mode = #tpu.pipeline_mode<synchronous>, transform_indices = @transform_1, window_bounds = array<i64: 256, 128>}, {pipeline_mode = #tpu.pipeline_mode<synchronous>, transform_indices = @transform_2, window_bounds = array<i64: 1, 5>}, {transform_indices = @transform_3, window_bounds = array<i64: 16, 5>}]} {
    %c0 = arith.constant 0 : index
    %c0_0 = arith.constant 0 : index
    %0 = vector.load %arg1[%c0, %c0_0] : memref<16x256xf32, #tpu.memory_space<vmem>>, vector<16x256xf32>
    %c0_1 = arith.constant 0 : index
    %c0_2 = arith.constant 0 : index
    %1 = vector.load %arg2[%c0_1, %c0_2] : memref<256x128xf32, #tpu.memory_space<vmem>>, vector<256x128xf32>
    %cst = arith.constant dense<0.000000e+00> : vector<16x128xf32>
    %2 = tpu.matmul %0, %1, %cst {dimension_numbers = #tpu.dot_dimension_numbers<[1], [0], [0], [1], [0, 0, 1, 1], [], []>} : vector<16x256xf32>, vector<256x128xf32>, vector<16x128xf32> -> vector<16x128xf32>
    %3 = vector.extract_strided_slice %2 {offsets = [0, 0], sizes = [16, 5], strides = [1, 1]} : vector<16x128xf32> to vector<16x5xf32>
    %c0_3 = arith.constant 0 : index
    %c0_4 = arith.constant 0 : index
    %4 = vector.load %arg3[%c0_3, %c0_4] : memref<1x5xf32, #tpu.memory_space<vmem>>, vector<1x5xf32>
    %5 = vector.broadcast %4 : vector<1x5xf32> to vector<16x5xf32>
    %6 = arith.addf %3, %5 : vector<16x5xf32>
    %c0_5 = arith.constant 0 : index
    %c0_6 = arith.constant 0 : index
    %7 = vector.load %arg4[%c0_5, %c0_6] : memref<16x5xf32, #tpu.memory_space<vmem>>, vector<16x5xf32>
    tpu.vector_store %arg4[%c0_5, %c0_6], %6 {strides = array<i32>} : memref<16x5xf32, #tpu.memory_space<vmem>>, vector<16x5xf32>,
    return
  }
  func.func @transform_0(%arg0: i32) -> (i32, i32) {
    %c0_i32 = arith.constant 0 : i32
    %c0_i32_0 = arith.constant 0 : i32
    return %arg0, %c0_i32 : i32, i32
  }
  func.func @transform_1(%arg0: i32) -> (i32, i32) {
    %c0_i32 = arith.constant 0 : i32
    %c0_i32_0 = arith.constant 0 : i32
    %c0_i32_1 = arith.constant 0 : i32
    return %c0_i32, %c0_i32_0 : i32, i32
  }
  func.func @transform_2(%arg0: i32) -> (i32, i32) {
    %c0_i32 = arith.constant 0 : i32
    %c0_i32_0 = arith.constant 0 : i32
    %c0_i32_1 = arith.constant 0 : i32
    return %c0_i32, %c0_i32_0 : i32, i32
  }
  func.func @transform_3(%arg0: i32) -> (i32, i32) {
    %c0_i32 = arith.constant 0 : i32
    %c0_i32_0 = arith.constant 0 : i32
    return %arg0, %c0_i32 : i32, i32
  }
}

</mosaic_0001>

<bundles_post_ra>
// kernel: tpu_custom_call.1
= control target key start
LH: loop header
LB: loop body
LE: loop exit
PB: predicated region body
PF: predicated region fallthrough
CT: control target
= control target key end

     0   :  { %8 = vsyncpa [#allocation3], 0  ;;  %s275_s0 = inlined_call_operand.hbm [shape: f32[16,256], index: 0, kind: input, shape index: {}]   ;;  %s276_s1 = inlined_call_operand.hbm [shape: f32[256,128], index: 1, kind: input, shape index: {}]   ;;  %s277_s2 = inlined_call_operand.vmem [shape: f32[1,5], index: 2, kind: input, shape index: {}]   ;;  %s278_s3 = inlined_call_operand.vmem [shape: f32[16,5], index: 3, kind: output, shape index: {}]  }
   0x1   :  { %s14_s14 = sshll.u32 %s275_s0, 4  ;;  %s15_s14 = int_to_ptr.hbm [resolvable:$true] %s14_s14 }
   0x2   :  { %9 = vsyncpa [#allocation5], 0  ;;  %s234_s15 = smov [#allocation2]   ;;  %s27_s19 = sshll.u32 %s276_s1, 4  ;;  %s28_s19 = int_to_ptr.hbm [resolvable:$true] %s27_s19 }
   0x3   :  { %s16_s16 = sshll.u32 %s234_s15, 4  ;;  %s235_s20 = smov 256   ;;  %s17_s16 = int_to_ptr.vmem [resolvable:$true] %s16_s16 }
   0x4   :  { %s236_s21 = smov 16   ;;  %s237_s22 = smov [#allocation4]  }
   0x5   :  { %22 = dma.hbm_to_vmem [thread:$0]  %s15_s14, 512, %s17_s16, [#allocation3], %s235_s20, %s235_s20, %s236_s21  }
   0x6   :  { %s29_s23 = sshll.u32 %s237_s22, 4  ;;  %s238_s24 = smov 128   ;;  %s30_s23 = int_to_ptr.vmem [resolvable:$true] %s29_s23 }
   0x7   :  { %s239_s25 = smov 8  }
   0x8   :  { %35 = dma.hbm_to_vmem [thread:$0]  %s28_s19, 4096, %s30_s23, [#allocation5], %s238_s24, %s238_s24, %s239_s25  }
   0x9   :  { %230 = dma.done.wait [#allocation3], 512  }
   0xa   :  { %231 = vsyncadd [#allocation3], 4294966784 }
   0xb   :  { %232 = dma.done.wait [#allocation5], 4096  }
   0xc   :  { %233 = vsyncadd [#allocation5], 4294963200  ;;  %v65_v0 = vld [vmem:[#allocation4 + $0x78] sm:$0xff]  ;;  %v64_v2 = vld [vmem:[#allocation4 + $0x70] sm:$0xff]  ;;  %vm134_vm0 = vcmask 39936  }
   0xd   :  { %v81_v1 = vld [vmem:[#allocation4 + $0xf8] sm:$0xff]  ;;  %143 = vmatpush.msra.mxu2 %v65_v0  ;;  %v80_v3 = vld [vmem:[#allocation4 + $0xf0] sm:$0xff]  ;;  %v63_v4 = vld [vmem:[#allocation4 + $0x68] sm:$0xff]  ;;  %82 = vmatpush.msra.mxu0 %v65_v0 }
   0xe   :  { %159 = vmatpush.msra.mxu3 %v81_v1  ;;  %v79_v5 = vld [vmem:[#allocation4 + $0xe8] sm:$0xff]  ;;  %105 = vmatpush.msra.mxu1 %v81_v1  ;;  %v62_v6 = vld [vmem:[#allocation4 + $0x60] sm:$0xff]  ;;  %v61_v8 = vld [vmem:[#allocation4 + $0x58] sm:$0xff] }
   0xf   :  { %144 = vmatpush.msra.mxu2 %v64_v2  ;;  %v78_v7 = vld [vmem:[#allocation4 + $0xe0] sm:$0xff]  ;;  %83 = vmatpush.msra.mxu0 %v64_v2  ;;  %v77_v9 = vld [vmem:[#allocation4 + $0xd8] sm:$0xff]  ;;  %v60_v10 = vld [vmem:[#allocation4 + $0x50] sm:$0xff] }
  0x10   :  { %160 = vmatpush.msra.mxu3 %v80_v3  ;;  %106 = vmatpush.msra.mxu1 %v80_v3  ;;  %v76_v11 = vld [vmem:[#allocation4 + $0xd0] sm:$0xff]  ;;  %v59_v12 = vld [vmem:[#allocation4 + $0x48] sm:$0xff]  ;;  %v58_v14 = vld [vmem:[#allocation4 + $0x40] sm:$0xff] }
  0x11   :  { %145 = vmatpush.msra.mxu2 %v63_v4  ;;  %84 = vmatpush.msra.mxu0 %v63_v4  ;;  %v75_v13 = vld [vmem:[#allocation4 + $0xc8] sm:$0xff]  ;;  %v74_v15 = vld [vmem:[#allocation4 + $0xc0] sm:$0xff]  ;;  %v57_v16 = vld [vmem:[#allocation4 + $0x38] sm:$0xff] }
  0x12   :  { %161 = vmatpush.msra.mxu3 %v79_v5  ;;  %107 = vmatpush.msra.mxu1 %v79_v5  ;;  %v73_v17 = vld [vmem:[#allocation4 + $0xb8] sm:$0xff]  ;;  %v56_v18 = vld [vmem:[#allocation4 + $0x30] sm:$0xff]  ;;  %v55_v20 = vld [vmem:[#allocation4 + $0x28] sm:$0xff] }
  0x13   :  { %146 = vmatpush.msra.mxu2 %v62_v6  ;;  %85 = vmatpush.msra.mxu0 %v62_v6  ;;  %v72_v19 = vld [vmem:[#allocation4 + $0xb0] sm:$0xff]  ;;  %v71_v21 = vld [vmem:[#allocation4 + $0xa8] sm:$0xff]  ;;  %v54_v22 = vld [vmem:[#allocation4 + $0x20] sm:$0xff] }
  0x14   :  { %162 = vmatpush.msra.mxu3 %v78_v7  ;;  %108 = vmatpush.msra.mxu1 %v78_v7  ;;  %v70_v23 = vld [vmem:[#allocation4 + $0xa0] sm:$0xff]  ;;  %v53_v24 = vld [vmem:[#allocation4 + $0x18] sm:$0xff]  ;;  %v52_v26 = vld [vmem:[#allocation4 + $0x10] sm:$0xff] }
  0x15   :  { %147 = vmatpush.msra.mxu2 %v61_v8  ;;  %86 = vmatpush.msra.mxu0 %v61_v8  ;;  %v69_v25 = vld [vmem:[#allocation4 + $0x98] sm:$0xff]  ;;  %v68_v27 = vld [vmem:[#allocation4 + $0x90] sm:$0xff]  ;;  %v51_v28 = vld [vmem:[#allocation4 + $0x8] sm:$0xff] }
  0x16   :  { %163 = vmatpush.msra.mxu3 %v77_v9  ;;  %109 = vmatpush.msra.mxu1 %v77_v9  ;;  %v67_v29 = vld [vmem:[#allocation4 + $0x88] sm:$0xff]  ;;  %v50_v30 = vld [vmem:[#allocation4] sm:$0xff]  ;;  %v48_v32 = vld [vmem:[#allocation2 + $0x10] sm:$0xff] }
  0x17   :  { %148 = vmatpush.msra.mxu2 %v60_v10  ;;  %87 = vmatpush.msra.mxu0 %v60_v10  ;;  %v66_v31 = vld [vmem:[#allocation4 + $0x80] sm:$0xff]  ;;  %v49_v33 = vld [vmem:[#allocation2 + $0x18] sm:$0xff]  ;;  %v47_v35 = vld [vmem:[#allocation2 + $0x8] sm:$0xff] }
  0x18   :  { %164 = vmatpush.msra.mxu3 %v76_v11  ;;  %110 = vmatpush.msra.mxu1 %v76_v11  ;;  %v46_v34 = vld [vmem:[#allocation2] sm:$0xff] }
  0x19   :  { %149 = vmatpush.msra.mxu2 %v59_v12  ;;  %88 = vmatpush.msra.mxu0 %v59_v12  ;;  %v181_v36 = vld [vmem:[%s277_s2] ss:$0 sm:$0xff] }
  0x1a   :  { %165 = vmatpush.msra.mxu3 %v75_v13  ;;  %111 = vmatpush.msra.mxu1 %v75_v13 }
  0x1b   :  { %150 = vmatpush.msra.mxu2 %v58_v14  ;;  %89 = vmatpush.msra.mxu0 %v58_v14 }
  0x1c   :  { %166 = vmatpush.msra.mxu3 %v74_v15  ;;  %112 = vmatpush.msra.mxu1 %v74_v15 }
  0x1d   :  { %151 = vmatpush.msra.mxu2 %v57_v16  ;;  %90 = vmatpush.msra.mxu0 %v57_v16 }
  0x1e   :  { %167 = vmatpush.msra.mxu3 %v73_v17  ;;  %113 = vmatpush.msra.mxu1 %v73_v17 }
  0x1f   :  { %152 = vmatpush.msra.mxu2 %v56_v18  ;;  %91 = vmatpush.msra.mxu0 %v56_v18 }
  0x20   :  { %168 = vmatpush.msra.mxu3 %v72_v19  ;;  %114 = vmatpush.msra.mxu1 %v72_v19 }
  0x21   :  { %153 = vmatpush.msra.mxu2 %v55_v20  ;;  %92 = vmatpush.msra.mxu0 %v55_v20 }
  0x22   :  { %169 = vmatpush.msra.mxu3 %v71_v21  ;;  %115 = vmatpush.msra.mxu1 %v71_v21 }
  0x23   :  { %154 = vmatpush.msra.mxu2 %v54_v22  ;;  %93 = vmatpush.msra.mxu0 %v54_v22 }
  0x24   :  { %170 = vmatpush.msra.mxu3 %v70_v23  ;;  %116 = vmatpush.msra.mxu1 %v70_v23 }
  0x25   :  { %155 = vmatpush.msra.mxu2 %v53_v24  ;;  %94 = vmatpush.msra.mxu0 %v53_v24 }
  0x26   :  { %171 = vmatpush.msra.mxu3 %v69_v25  ;;  %117 = vmatpush.msra.mxu1 %v69_v25 }
  0x27   :  { %156 = vmatpush.msra.mxu2 %v52_v26  ;;  %95 = vmatpush.msra.mxu0 %v52_v26 }
  0x28   :  { %172 = vmatpush.msra.mxu3 %v68_v27  ;;  %118 = vmatpush.msra.mxu1 %v68_v27 }
  0x29   :  { %157 = vmatpush.msra.mxu2 %v51_v28  ;;  %96 = vmatpush.msra.mxu0 %v51_v28 }
  0x2a   :  { %173 = vmatpush.msra.mxu3 %v67_v29  ;;  %119 = vmatpush.msra.mxu1 %v67_v29 }
  0x2b   :  { %158 = vmatpush.msra.mxu2 %v50_v30  ;;  %97 = vmatpush.msra.mxu0 %v50_v30 }
  0x2c   :  { %174 = vmatpush.msra.mxu3 %v66_v31  ;;  %101 = vmatmul.f32.vlgmr.msra.gmra.mxu2 %v48_v32 }
  0x2d   :  { %124 = vmatmul.f32.vlgmr.msra.gmra.mxu3 %v49_v33  ;;  %120 = vmatpush.msra.mxu1 %v66_v31 }
  0x2e   :  { %98 = vmatmul.f32.vlgmr.msra.gmra.mxu0 %v46_v34  ;;  %121 = vmatmul.f32.vlgmr.msra.gmra.mxu1 %v47_v35 }
  0xab   :  { %v99_v37 = vpop.f32.mrf.mxu0  ;;  %v122_v38 = vpop.f32.mrf.mxu1 }
  0xac   :  { %v123_v39 = vadd.f32 %v122_v38, %v99_v37 }
  0xae   :  { %v132_v40 = vadd.f32 %v181_v36, %v123_v39 }
  0xaf   :  { %v102_v41 = vpop.f32.mrf.mxu2 }
  0xb0   :  { %v125_v42 = vpop.f32.mrf.mxu3  ;;  %135 = vst.msk [vmem:[%s278_s3] sm:$0xff] %vm134_vm0, %v132_v40 }
  0xb1   :  { %v126_v43 = vadd.f32 %v125_v42, %v102_v41 }
  0xb3   :  { %v133_v44 = vadd.f32 %v181_v36, %v126_v43 }
  0xb5   :  { %136 = vst.msk [vmem:[%s278_s3 + $0x8] sm:$0xff] %vm134_vm0, %v133_v44 }
  0xb6   :  { %141 = vsyncpa [#allocation3], 1 }
  0xb7   :  { %142 = vsyncpa [#allocation5], 1 }

</bundles_post_ra>
